<compile_context>
chip_gen: v7x
topology: tpu7x:2x2x1
jax: 0.10.0
libtpu: 0.0.40
codegen_flags: <defaults>
</compile_context>

<pallas_src>
import jax
import jax.numpy as jnp
from jax import lax
from jax.experimental import pallas as pl
from jax.experimental.pallas import tpu as pltpu


def _self_attention_kernel(x_ref, w_ref, out_ref):
    # x_ref: (B, S, F) full batch; w_ref: (F, 3D) fused Wk|Wq|Wv; out_ref: (B, D)
    B, S, F = x_ref.shape
    D = out_ref.shape[1]

    # Fused projection: one MXU push over all B*S rows.
    x2 = x_ref[...].reshape(B * S, F)                             # (B*S, F)
    kqv = jnp.dot(x2, w_ref[...],
                  preferred_element_type=jnp.float32)             # (B*S, 3D)
    kqv = kqv.reshape(B, S, 3 * D)
    k = kqv[:, :, 0:D]                                            # (B, S, D)
    q = kqv[:, :, D:2 * D]                                        # (B, S, D)
    v = kqv[:, :, 2 * D:3 * D]                                    # (B, S, D)

    # score = bmm(k, q^T): contract the D axis directly (no materialized q.T).
    score = lax.dot_general(
        k, q,
        dimension_numbers=(((2,), (2,)), ((0,), (0,))),
        preferred_element_type=jnp.float32)                       # (B, S, S)

    # softmax over dim=2 (last axis), numerically stabilized; EUP reciprocal.
    score = score - jnp.max(score, axis=-1, keepdims=True)
    p = jnp.exp(score)
    attn = p * pl.reciprocal(jnp.sum(p, axis=-1, keepdims=True), approx=True)

    # out = bmm(attn, v), batched on the MXU.
    out = lax.dot_general(
        attn, v,
        dimension_numbers=(((2,), (1,)), ((0,), (0,))),
        preferred_element_type=jnp.float32)                       # (B, S, D)

    # max_pool2d((4,1)) + reshape(B, D): max over seq rows 0..3 (valid 4<=S<=7).
    pooled = jnp.max(out[:, 0:4, :], axis=1)                      # (B, D)
    out_ref[...] = pooled.astype(out_ref.dtype)


def self_attention_layer(drug, wk, wq, wv):
    """drug: (B, S, F) float32; wk/wq/wv: (F, D). Returns (B, D)."""
    B, S, F = drug.shape
    D = wk.shape[1]

    # Fuse the three projection weights into a single (F, 3D) operand.
    w_kqv = jnp.concatenate([wk, wq, wv], axis=1)                 # (F, 3D)

    return pl.pallas_call(
        _self_attention_kernel,
        out_shape=jax.ShapeDtypeStruct((B, D), drug.dtype),
        grid_spec=pltpu.PrefetchScalarGridSpec(
            num_scalar_prefetch=0,
            grid=(1,),  # whole batch in one grid step
            in_specs=[
                pl.BlockSpec((B, S, F), lambda i: (0, 0, 0)),
                pl.BlockSpec((F, 3 * D), lambda i: (0, 0)),
            ],
            out_specs=pl.BlockSpec((B, D), lambda i: (0, 0)),
        ),
        compiler_params=pltpu.CompilerParams(
            dimension_semantics=("arbitrary",)),
    )(drug, w_kqv)


def _reference(drug, wk, wq, wv):
    k = drug @ wk
    q = drug @ wq
    v = drug @ wv
    score = jnp.einsum("bsd,btd->bst", k, q)
    attn = jax.nn.softmax(score, axis=2)
    out = jnp.einsum("bst,btd->bsd", attn, v)
    pooled = jnp.max(out[:, 0:4, :], axis=1)  # floor(S/4)==1 window
    return pooled


if __name__ == "__main__":
    # in_feature=32, head_num=4 -> D=8; batch=2, seq=4 (required by the
    # max_pool2d(4,1) + reshape in the original forward).
    B, S, IN_FEATURE, HEAD_NUM = 2, 4, 32, 4
    D = IN_FEATURE // HEAD_NUM

    key = jax.random.PRNGKey(0)
    kx, kk, kq, kv = jax.random.split(key, 4)
    drug = jax.random.normal(kx, (B, S, IN_FEATURE), dtype=jnp.float32)
    # Deterministic synthetic weights, stored transposed as (F, D).
    scale = 1.0 / jnp.sqrt(jnp.float32(IN_FEATURE))
    wk = jax.random.normal(kk, (IN_FEATURE, D), dtype=jnp.float32) * scale
    wq = jax.random.normal(kq, (IN_FEATURE, D), dtype=jnp.float32) * scale
    wv = jax.random.normal(kv, (IN_FEATURE, D), dtype=jnp.float32) * scale

    out = jax.block_until_ready(self_attention_layer(drug, wk, wq, wv))
    ref = _reference(drug, wk, wq, wv)
    assert out.shape == (B, D), out.shape
    # Tolerance loosened slightly for the EUP approximate reciprocal in the
    # softmax denominator (values are O(1); real bugs show up at >>1e-2).
    assert jnp.allclose(out, ref, atol=2e-3, rtol=2e-3), "mismatch vs reference"
    print("KERNEL_OK")
</pallas_src>

<mosaic_0001>
module attributes {stable_mosaic.version = 11 : i64} {
  func.func @_self_attention_kernel(%arg0: i32, %arg1: memref<2x4x32xf32, #tpu.memory_space<vmem>>, %arg2: memref<32x24xf32, #tpu.memory_space<vmem>>, %arg3: memref<2x8xf32, #tpu.memory_space<vmem>>) attributes {dimension_semantics = [#tpu.dimension_semantics<arbitrary>], iteration_bounds = array<i64: 1>, scalar_prefetch = 0 : i64, scratch_operands = 0 : i64, tpu.core_type = #tpu.core_type<tc>, window_params = [{pipeline_mode = #tpu.pipeline_mode<synchronous>, transform_indices = @transform_0, window_bounds = array<i64: 2, 4, 32>}, {pipeline_mode = #tpu.pipeline_mode<synchronous>, transform_indices = @transform_1, window_bounds = array<i64: 32, 24>}, {pipeline_mode = #tpu.pipeline_mode<synchronous>, transform_indices = @transform_2, window_bounds = array<i64: 2, 8>}]} {
    %c0 = arith.constant 0 : index
    %c0_0 = arith.constant 0 : index
    %c0_1 = arith.constant 0 : index
    %0 = vector.load %arg1[%c0, %c0_0, %c0_1] : memref<2x4x32xf32, #tpu.memory_space<vmem>>, vector<2x4x32xf32>
    %1 = vector.shape_cast %0 : vector<2x4x32xf32> to vector<8x32xf32>
    %c0_2 = arith.constant 0 : index
    %c0_3 = arith.constant 0 : index
    %2 = vector.load %arg2[%c0_2, %c0_3] : memref<32x24xf32, #tpu.memory_space<vmem>>, vector<32x24xf32>
    %cst = arith.constant dense<0.000000e+00> : vector<8x24xf32>
    %3 = tpu.matmul %1, %2, %cst {dimension_numbers = #tpu.dot_dimension_numbers<[1], [0], [0], [1], [0, 0, 1, 1], [], []>} : vector<8x32xf32>, vector<32x24xf32>, vector<8x24xf32> -> vector<8x24xf32>
    %4 = vector.shape_cast %3 : vector<8x24xf32> to vector<2x4x24xf32>
    %5 = vector.extract_strided_slice %4 {offsets = [0, 0, 0], sizes = [2, 4, 8], strides = [1, 1, 1]} : vector<2x4x24xf32> to vector<2x4x8xf32>
    %6 = vector.extract_strided_slice %4 {offsets = [0, 0, 8], sizes = [2, 4, 8], strides = [1, 1, 1]} : vector<2x4x24xf32> to vector<2x4x8xf32>
    %7 = vector.extract_strided_slice %4 {offsets = [0, 0, 16], sizes = [2, 4, 8], strides = [1, 1, 1]} : vector<2x4x24xf32> to vector<2x4x8xf32>
    %cst_4 = arith.constant dense<0.000000e+00> : vector<2x4x4xf32>
    %8 = tpu.matmul %5, %6, %cst_4 {dimension_numbers = #tpu.dot_dimension_numbers<[2], [2], [1], [1], [0, 0, 0, 1, 1, 1], [0], [0]>} : vector<2x4x8xf32>, vector<2x4x8xf32>, vector<2x4x4xf32> -> vector<2x4x4xf32>
    %cst_5 = arith.constant dense<0xFF800000> : vector<2x4xf32>
    %9 = vector.multi_reduction <maximumf>, %8, %cst_5 [2] : vector<2x4x4xf32> to vector<2x4xf32>
    %10 = vector.shape_cast %9 : vector<2x4xf32> to vector<2x4x1xf32>
    %11 = vector.broadcast %10 : vector<2x4x1xf32> to vector<2x4x4xf32>
    %12 = arith.subf %8, %11 : vector<2x4x4xf32>
    %13 = math.exp %12 : vector<2x4x4xf32>
    %cst_6 = arith.constant dense<0.000000e+00> : vector<2x4xf32>
    %14 = vector.multi_reduction <add>, %13, %cst_6 [2] : vector<2x4x4xf32> to vector<2x4xf32>
    %15 = vector.shape_cast %14 : vector<2x4xf32> to vector<2x4x1xf32>
    %16 = tpu.reciprocal %15 {approx = true} : vector<2x4x1xf32> -> vector<2x4x1xf32>
    %17 = vector.broadcast %16 : vector<2x4x1xf32> to vector<2x4x4xf32>
    %18 = arith.mulf %13, %17 : vector<2x4x4xf32>
    %cst_7 = arith.constant dense<0.000000e+00> : vector<2x4x8xf32>
    %19 = tpu.matmul %18, %7, %cst_7 {dimension_numbers = #tpu.dot_dimension_numbers<[2], [1], [1], [2], [0, 0, 0, 1, 1, 2], [0], [0]>} : vector<2x4x4xf32>, vector<2x4x8xf32>, vector<2x4x8xf32> -> vector<2x4x8xf32>
    %cst_8 = arith.constant dense<0xFF800000> : vector<2x8xf32>
    %20 = vector.multi_reduction <maximumf>, %19, %cst_8 [1] : vector<2x4x8xf32> to vector<2x8xf32>
    %c0_9 = arith.constant 0 : index
    %c0_10 = arith.constant 0 : index
    %21 = vector.load %arg3[%c0_9, %c0_10] : memref<2x8xf32, #tpu.memory_space<vmem>>, vector<2x8xf32>
    tpu.vector_store %arg3[%c0_9, %c0_10], %20 {strides = array<i32>} : memref<2x8xf32, #tpu.memory_space<vmem>>, vector<2x8xf32>,
    return
  }
  func.func @transform_0(%arg0: i32) -> (i32, i32, i32) {
    %c0_i32 = arith.constant 0 : i32
    %c0_i32_0 = arith.constant 0 : i32
    %c0_i32_1 = arith.constant 0 : i32
    %c0_i32_2 = arith.constant 0 : i32
    return %c0_i32, %c0_i32_0, %c0_i32_1 : i32, i32, i32
  }
  func.func @transform_1(%arg0: i32) -> (i32, i32) {
    %c0_i32 = arith.constant 0 : i32
    %c0_i32_0 = arith.constant 0 : i32
    %c0_i32_1 = arith.constant 0 : i32
    return %c0_i32, %c0_i32_0 : i32, i32
  }
  func.func @transform_2(%arg0: i32) -> (i32, i32) {
    %c0_i32 = arith.constant 0 : i32
    %c0_i32_0 = arith.constant 0 : i32
    %c0_i32_1 = arith.constant 0 : i32
    return %c0_i32, %c0_i32_0 : i32, i32
  }
}

</mosaic_0001>

<bundles_post_ra>
// kernel: tpu_custom_call.1
= control target key start
LH: loop header
LB: loop body
LE: loop exit
PB: predicated region body
PF: predicated region fallthrough
CT: control target
= control target key end

     0   :  { %v562_v3 = vmov 0.0|0.0   ;;  %vm563_vm0 = vmmov 0   ;;  %v564_v6 = vmov 0.0   ;;  %s621_s0 = inlined_call_operand.vmem [shape: f32[2,4,32], index: 0, kind: input, shape index: {}]   ;;  %s622_s1 = inlined_call_operand.vmem [shape: f32[32,24], index: 1, kind: input, shape index: {}]   ;;  %s623_s2 = inlined_call_operand.hbm [shape: f32[2,8], index: 2, kind: output, shape index: {}]  }
   0x1   :  { %v14_v0 = vld [vmem:[%s622_s1] sm:$0xff]  ;;  %v15_v1 = vld [vmem:[%s622_s1 + $0x8] sm:$0xff]  ;;  %v16_v2 = vld [vmem:[%s622_s1 + $0x10] sm:$0xff]  ;;  %517 = vmatprep.subr.bf16.mxu0 %v562_v3  ;;  %494 = vmatprep.mubr.msk.f32.mxu0 %vm563_vm0, %v564_v6 }
   0x2   :  { %v518_v4 = vpack.c.bf16 %v15_v1, %v14_v0  ;;  %v17_v5 = vld [vmem:[%s622_s1 + $0x18] sm:$0xff]  ;;  %497 = vmatprep.subr.mxu1 %v564_v6  ;;  %499 = vmatprep.mubr.msk.f32.mxu1 %vm563_vm0, %v564_v6 }
   0x3   :  { %7 = vsyncpa [#allocation3], 0  ;;  %v521_v7 = vpack.c.bf16 %v17_v5, %v16_v2  ;;  %v529_v8 = vld [vmem:[%s621_s0] sm:$0xff]   ;;  %vm21_vm1 = vcmask 261120   ;;  %s565_s1 = smov 120   ;;  %vm98_vm2 = vcmask 64512  }
   0x4   :  { %519 = vmatpush3.bf16.msra.mxu0 %v518_v4  ;;  %vm249_vm3 = vcmask 27648   ;;  %s566_s0 = smov 112   ;;  %vm278_vm4 = vcmask 1043456   ;;  %vm274_vm5 = vcmask 31744   ;;  %vm428_vm6 = vcmask 60416   ;;  %s567_s19 = smov [#allocation2]  }
   0x5   :  { %520 = vmatprep.subr.bf16.mxu0 %v562_v3  ;;  %s456_s20 = sshll.u32 %s567_s19, 4  ;;  %vm445_vm7 = vcmask 1041409   ;;  %vm448_vm8 = vcmask 58368   ;;  %s457_s20 = int_to_ptr.vmem [resolvable:$true] %s456_s20 }
   0x6   :  { %s538_s21 = scalar_lea.vmem %s457_s20, 32  ;;  %p543_p1 = scmp.lt.s32.totalorder %s457_s20, %s457_s20 }
   0x7   :  { %p539_p0 = scmp.ne.s32.totalorder %s457_s20, %s538_s21  ;;  %p544_p2 = scmp.lt.s32.totalorder %s538_s21, %s538_s21 }
   0x8   :  { %522 = vmatpush3.bf16.msra.mxu0 %v521_v7 }
   0x9   :  { %507 = vmatprep.subr.mxu0 %v564_v6  ;;  %p545_p3 = por %p544_p2, %p543_p1 }
   0xb   :  { %495 = vmatmul.mubr.msk.f32.vlgmr.msra.gmra.mrb[0].mxu0 %vm21_vm1, %v529_v8  ;;  %p546_p4 = pnand %p545_p3, %p539_p0 }
   0xc   :  { %509 = vmatprep.mubr.msk.f32.mxu0 %vm563_vm0, %v564_v6 }
  0xde   :  { %v90_v9 = vpop.f32.mrb[0].mxu0 }
  0xdf   :  { %96 = vrot.lane.b32.xlu0 %v90_v9, %s565_s1  ;;  %v496_v10 = vpop.f32.mrb[1].mxu0  ;;  %v95_v11 = vcombine.high %v90_v9, %v90_v9 }
  0xe3   :  { %173 = vrot.lane.b32.xlu0 %v95_v11, %s565_s1 }
 0x151   :  { %v97_v12 = vpop.permute.xlu0 %96 }
 0x152   :  { %498 = vmatpush3.xpose.msk.msra.mxu1 %vm98_vm2, %v97_v12 }
 0x153   :  { %502 = vmatprep.subr.mxu1 %v564_v6 }
 0x155   :  { %500 = vmatmul.mubr.msk.f32.vlgmr.msra.gmra.mrb[0].mxu1 %vm98_vm2, %v90_v9  ;;  %v174_v13 = vpop.permute.xlu0 %173 }
 0x156   :  { %503 = vmatpush3.xpose.msk.msra.mxu1 %vm98_vm2, %v174_v13  ;;  %504 = vmatprep.mubr.msk.f32.mxu1 %vm563_vm0, %v564_v6 }
 0x157   :  { %512 = vmatprep.subr.mxu1 %v564_v6 }
 0x159   :  { %505 = vmatmul.mubr.msk.f32.vlgmr.msra.gmra.mrb[2].mxu1 %vm98_vm2, %v95_v11 }
 0x15a   :  { %514 = vmatprep.mubr.msk.f32.mxu1 %vm563_vm0, %v564_v6 }
 0x228   :  { %v169_v14 = vpop.f32.mrb[0].mxu1 }
 0x229   :  { %v501_v15 = vpop.f32.mrb[1].mxu1  ;;  %v250_v16 = vsel %vm249_vm3, %v169_v14, -inf }
 0x22a   :  { %251 = vmax.xlane.f32.xlu1 %v250_v16 }
 0x22c   :  { %v245_v17 = vpop.f32.mrb[2].mxu1 }
 0x22d   :  { %v506_v18 = vpop.f32.mrb[3].mxu1  ;;  %v253_v19 = vsel %vm249_vm3, %v245_v17, -inf }
 0x22e   :  { %254 = vmax.xlane.f32.xlu1 %v253_v19 }
 0x23f   :  { %272 = vrot.lane.b32.xlu1 %v90_v9, %s566_s0 }
 0x2b7   :  { %v252_v20 = vpop.xlane.xlu1 %251 }
 0x2b8   :  { %v256_v21 = vsub.f32 %v169_v14, %v252_v20 }
 0x2ba   :  { %v258_v22 = vmul.f32 1.442695, %v256_v21 }
 0x2bb   :  { %v255_v23 = vpop.xlane.xlu1 %254 }
 0x2bc   :  { %530 = vpow2.f32 %v258_v22  ;;  %v257_v24 = vsub.f32 %v245_v17, %v255_v23 }
 0x2be   :  { %v260_v25 = vmul.f32 1.442695, %v257_v24 }
 0x2bf   :  { %v273_v26 = vpop.permute.xlu1 %272 }
 0x2c0   :  { %532 = vpow2.f32 %v260_v25  ;;  %508 = vmatpush3.msk.msra.mxu0 %vm278_vm4, %v273_v26 }
 0x2c6   :  { %v531_v27 = vpop.eup %530 }
 0x2c7   :  { %v262_v28 = vsel %vm249_vm3, %v531_v27, 0.0 }
 0x2c8   :  { %263 = vadd.xlane.f32.xlu0 %v262_v28 }
 0x2ca   :  { %v533_v29 = vpop.eup %532 }
 0x2cb   :  { %v265_v30 = vsel %vm249_vm3, %v533_v29, 0.0 }
 0x2cc   :  { %266 = vadd.xlane.f32.xlu1 %v265_v30 }
 0x2dd   :  { %351 = vrot.lane.b32.xlu1 %v95_v11, %s566_s0 }
 0x355   :  { %v264_v31 = vpop.xlane.xlu0 %263 }
 0x356   :  { %534 = vrcp.f32 %v264_v31 }
 0x359   :  { %v267_v32 = vpop.xlane.xlu1 %266 }
 0x35a   :  { %536 = vrcp.f32 %v267_v32 }
 0x35d   :  { %v352_v33 = vpop.permute.xlu1 %351 }
 0x35e   :  { %513 = vmatpush3.msk.msra.mxu1 %vm278_vm4, %v352_v33 }
 0x360   :  { %v535_v34 = vpop.eup %534 }
 0x361   :  { %v270_v35 = vmul.f32 %v535_v34, %v531_v27 }
 0x363   :  { %510 = vmatmul.mubr.msk.f32.vlgmr.msra.gmra.mrb[2].mxu0 %vm274_vm5, %v270_v35 }
 0x364   :  { %v537_v36 = vpop.eup %536 }
 0x365   :  { %v271_v37 = vmul.f32 %v537_v36, %v533_v29 }
 0x367   :  { %515 = vmatmul.mubr.msk.f32.vlgmr.msra.gmra.mrb[4].mxu1 %vm274_vm5, %v271_v37 }
 0x436   :  { %v347_v38 = vpop.f32.mrb[2].mxu0 }
 0x437   :  { %v429_v39 = vsel %vm428_vm6, %v347_v38, -inf  ;;  %v511_v40 = vpop.f32.mrb[3].mxu0 }
 0x438   :  { %v430_v41 = vrot.slane %v429_v39, 4 }
 0x43a   :  { %v431_v42 = vmax.f32 %v429_v39, %v430_v41  ;;  %v424_v43 = vpop.f32.mrb[4].mxu1 }
 0x43b   :  { %v436_v44 = vsel %vm428_vm6, %v424_v43, -inf  ;;  %v516_v45 = vpop.f32.mrb[5].mxu1 }
 0x43c   :  { %v432_v46 = vrot.slane %v431_v42, 2  ;;  %v437_v47 = vrot.slane %v436_v44, 4 }
 0x43e   :  { %v433_v48 = vmax.f32 %v431_v42, %v432_v46  ;;  %v438_v49 = vmax.f32 %v436_v44, %v437_v47 }
 0x440   :  { %v439_v50 = vrot.slane %v438_v49, 2  ;;  %v434_v51 = vrot.slane %v433_v48, 1 }
 0x442   :  { %v440_v52 = vmax.f32 %v438_v49, %v439_v50  ;;  %v435_v54 = vmax.f32 %v433_v48, %v434_v51 }
 0x444   :  { %v441_v53 = vrot.slane %v440_v52, 1 }
 0x446   :  { %v442_v55 = vmax.f32 %v440_v52, %v441_v53 }
 0x448   :  { %v446_v56 = vsel %vm445_vm7, %v442_v55, %v435_v54 }
 0x449   :  { %449 = vst.msk [vmem:[#allocation2] sm:$0x3] %vm448_vm8, %v446_v56 }
 0x44a   :  { %549 = shalt.err (!%p546_p4)
}
 0x44b   :  { %s550_s24 = scalar_lea.hbm %s623_s2, 32 }
 0x44c   :  { %p551_p5 = scmp.ne.s32.totalorder %s623_s2, %s550_s24  ;;  %p554_p6 = scmp.lt.u32.totalorder %s550_s24, %s623_s2 }
 0x44e   :  { %p556_p7 = pnand %p554_p6, %p551_p5 }
 0x450   :  { %559 = shalt.err (!%p556_p7)
}
 0x451   :  { %459 = dma.vmem_to_hbm [thread:$0]  %s457_s20, 32, %s623_s2, [#allocation3]  }
 0x452   :  { %560 = dma.done.wait [#allocation3], 32  }
 0x453   :  { %561 = vsyncadd [#allocation3], 4294967264 }
 0x454   :  { %463 = vsyncpa [#allocation3], 1 }

</bundles_post_ra>
